<compile_context>
chip_gen: v6e
topology: v6e:2x2x1
jax: 0.10.0
libtpu: 0.0.40
codegen_flags: <defaults>
</compile_context>

<pallas_src>
import jax
import jax.numpy as jnp
from jax.experimental import pallas as pl
from jax.experimental.pallas import tpu as pltpu

N_STATES = 8
H1 = 600
H2 = 300
H1P = 640   # 600 padded up to a multiple of 128 (lane width)
H2P = 384   # 300 padded up to a multiple of 128
OUT = 1
MAX_TB = 512  # batch tile for large batches


def _value_mlp_kernel(x_ref, w1_ref, b1_ref, w2_ref, b2_ref, w3_ref, b3_ref, o_ref):
    # One batch tile of the fused 3-layer MLP. Weights are resident (constant index_map).
    x = x_ref[...].astype(jnp.bfloat16)                                   # (TB, n_states)
    h1 = jnp.dot(x, w1_ref[...], preferred_element_type=jnp.float32) + b1_ref[...]
    h1 = jnp.maximum(h1, 0.0)                                             # relu(fc1), (TB, H1P) f32
    h2 = jnp.dot(h1.astype(jnp.bfloat16), w2_ref[...],
                 preferred_element_type=jnp.float32) + b2_ref[...]
    h2 = jnp.maximum(h2, 0.0)                                             # relu(fc2), (TB, H2P) f32
    # Value head (H2P -> 1): elementwise mul + lane reduce on VPU/XLU; skips an MXU
    # pass whose output would be padded to 128 lanes for 1 useful column.
    v = jnp.sum(h2 * w3_ref[...], axis=-1, keepdims=True) + b3_ref[...]   # (TB, 1)
    o_ref[...] = jnp.maximum(v, 0.0).astype(o_ref.dtype)                  # relu(v)


@jax.jit
def value_network_forward(state, w1, b1, w2, b2, w3, b3):
    """state: (B, n_states) f32. Returns (B, 1) f32, matching ValueNetwork.forward."""
    B, n_states = state.shape
    # Small batches: single full-array block (exempt from (8,128) divisibility), no pad.
    # Large batches: tile the batch; Pallas handles the trailing partial block.
    TB = B if B <= MAX_TB else MAX_TB
    grid = (pl.cdiv(B, TB),)

    def resident(shape):
        return pl.BlockSpec(shape, lambda i, _s=shape: tuple(0 for _ in _s))

    return pl.pallas_call(
        _value_mlp_kernel,
        out_shape=jax.ShapeDtypeStruct((B, OUT), jnp.float32),
        grid=grid,
        in_specs=[
            pl.BlockSpec((TB, n_states), lambda i: (i, 0)),   # x: tiled over batch
            resident((n_states, H1P)),  resident((1, H1P)),   # fc1 W (bf16) / b (f32)
            resident((H1P, H2P)),       resident((1, H2P)),   # fc2 W (bf16) / b (f32)
            resident((1, H2P)),         resident((1, OUT)),   # v-head row / bias (f32)
        ],
        out_specs=pl.BlockSpec((TB, OUT), lambda i: (i, 0)),
        compiler_params=pltpu.CompilerParams(
            dimension_semantics=("parallel",)),                # v7x: shard batch across TCs
    )(state, w1, b1, w2, b2, w3, b3)


def init_params(key, n_states=N_STATES):
    """Deterministic init mimicking nn.Linear default (uniform(-1/sqrt(fan_in), +)).

    Returns lane-padded parameters: matmul weights in bf16 laid out (in_features,
    out_features); biases in f32; padded rows/cols are zero and thus inert through ReLU.
    """
    def linear(k, fan_in, fan_out):
        kw, kb = jax.random.split(k)
        bound = 1.0 / jnp.sqrt(fan_in)
        w = jax.random.uniform(kw, (fan_in, fan_out), jnp.float32, -bound, bound)
        b = jax.random.uniform(kb, (fan_out,), jnp.float32, -bound, bound)
        return w, b

    k1, k2, k3 = jax.random.split(key, 3)
    w1, b1 = linear(k1, n_states, H1)   # (n_states, 600), (600,)
    w2, b2 = linear(k2, H1, H2)         # (600, 300), (300,)
    w3, b3 = linear(k3, H2, OUT)        # (300, 1), (1,)

    w1p = jnp.zeros((n_states, H1P), jnp.float32).at[:, :H1].set(w1).astype(jnp.bfloat16)
    b1p = jnp.zeros((1, H1P), jnp.float32).at[:, :H1].set(b1)
    w2p = jnp.zeros((H1P, H2P), jnp.float32).at[:H1, :H2].set(w2).astype(jnp.bfloat16)
    b2p = jnp.zeros((1, H2P), jnp.float32).at[:, :H2].set(b2)
    w3p = jnp.zeros((1, H2P), jnp.float32).at[:, :H2].set(w3[:, 0])   # f32 row vector
    b3p = b3.reshape(1, OUT)
    return w1p, b1p, w2p, b2p, w3p, b3p


def reference_forward(state, w1, b1, w2, b2, w3, b3):
    """Pure-JAX reference using the same bf16-rounded weights / f32 accumulation."""
    x = state.astype(jnp.bfloat16).astype(jnp.float32)
    h = jnp.maximum(x @ w1.astype(jnp.float32) + b1, 0.0)
    h = jnp.maximum(h.astype(jnp.bfloat16).astype(jnp.float32) @ w2.astype(jnp.float32) + b2, 0.0)
    v = jnp.sum(h * w3, axis=-1, keepdims=True) + b3
    return jnp.maximum(v, 0.0)


if __name__ == "__main__":
    key = jax.random.PRNGKey(0)
    kp, kx = jax.random.split(key)
    params = init_params(kp, N_STATES)

    batch = 2
    state = jax.random.normal(kx, (batch, N_STATES), jnp.float32)

    out = jax.block_until_ready(value_network_forward(state, *params))
    ref = reference_forward(state, *params)

    assert out.shape == (batch, 1), out.shape
    assert jnp.allclose(out, ref, atol=1e-4, rtol=1e-4), (out, ref)
    print("KERNEL_OK")
</pallas_src>

<mosaic_0001>
module attributes {stable_mosaic.version = 11 : i64} {
  func.func @_value_mlp_kernel(%arg0: i32, %arg1: memref<2x8xf32, #tpu.memory_space<vmem>>, %arg2: memref<8x640xbf16, #tpu.memory_space<vmem>>, %arg3: memref<1x640xf32, #tpu.memory_space<vmem>>, %arg4: memref<640x384xbf16, #tpu.memory_space<vmem>>, %arg5: memref<1x384xf32, #tpu.memory_space<vmem>>, %arg6: memref<1x384xf32, #tpu.memory_space<vmem>>, %arg7: memref<1x1xf32, #tpu.memory_space<vmem>>, %arg8: memref<2x1xf32, #tpu.memory_space<vmem>>) attributes {dimension_semantics = [#tpu.dimension_semantics<parallel>], iteration_bounds = array<i64: 1>, scalar_prefetch = 0 : i64, scratch_operands = 0 : i64, tpu.core_type = #tpu.core_type<tc>, window_params = [{transform_indices = @transform_0, window_bounds = array<i64: 2, 8>}, {pipeline_mode = #tpu.pipeline_mode<synchronous>, transform_indices = @transform_1, window_bounds = array<i64: 8, 640>}, {pipeline_mode = #tpu.pipeline_mode<synchronous>, transform_indices = @transform_2, window_bounds = array<i64: 1, 640>}, {pipeline_mode = #tpu.pipeline_mode<synchronous>, transform_indices = @transform_3, window_bounds = array<i64: 640, 384>}, {pipeline_mode = #tpu.pipeline_mode<synchronous>, transform_indices = @transform_4, window_bounds = array<i64: 1, 384>}, {pipeline_mode = #tpu.pipeline_mode<synchronous>, transform_indices = @transform_5, window_bounds = array<i64: 1, 384>}, {pipeline_mode = #tpu.pipeline_mode<synchronous>, transform_indices = @transform_6, window_bounds = array<i64: 1, 1>}, {transform_indices = @transform_7, window_bounds = array<i64: 2, 1>}]} {
    %c0 = arith.constant 0 : index
    %c0_0 = arith.constant 0 : index
    %0 = vector.load %arg1[%c0, %c0_0] : memref<2x8xf32, #tpu.memory_space<vmem>>, vector<2x8xf32>
    %1 = arith.truncf %0 : vector<2x8xf32> to vector<2x8xbf16>
    %c0_1 = arith.constant 0 : index
    %c0_2 = arith.constant 0 : index
    %2 = vector.load %arg2[%c0_1, %c0_2] : memref<8x640xbf16, #tpu.memory_space<vmem>>, vector<8x640xbf16>
    %cst = arith.constant dense<0.000000e+00> : vector<2x640xf32>
    %3 = tpu.matmul %1, %2, %cst {dimension_numbers = #tpu.dot_dimension_numbers<[1], [0], [0], [1], [0, 0, 1, 1], [], []>} : vector<2x8xbf16>, vector<8x640xbf16>, vector<2x640xf32> -> vector<2x640xf32>
    %c0_3 = arith.constant 0 : index
    %c0_4 = arith.constant 0 : index
    %4 = vector.load %arg3[%c0_3, %c0_4] : memref<1x640xf32, #tpu.memory_space<vmem>>, vector<1x640xf32>
    %5 = vector.broadcast %4 : vector<1x640xf32> to vector<2x640xf32>
    %6 = arith.addf %3, %5 : vector<2x640xf32>
    %cst_5 = arith.constant 0.000000e+00 : f32
    %7 = vector.broadcast %cst_5 : f32 to vector<2x640xf32>
    %8 = arith.maximumf %6, %7 : vector<2x640xf32>
    %9 = arith.truncf %8 : vector<2x640xf32> to vector<2x640xbf16>
    %c0_6 = arith.constant 0 : index
    %c0_7 = arith.constant 0 : index
    %10 = vector.load %arg4[%c0_6, %c0_7] : memref<640x384xbf16, #tpu.memory_space<vmem>>, vector<640x384xbf16>
    %cst_8 = arith.constant dense<0.000000e+00> : vector<2x384xf32>
    %11 = tpu.matmul %9, %10, %cst_8 {dimension_numbers = #tpu.dot_dimension_numbers<[1], [0], [0], [1], [0, 0, 1, 1], [], []>} : vector<2x640xbf16>, vector<640x384xbf16>, vector<2x384xf32> -> vector<2x384xf32>
    %c0_9 = arith.constant 0 : index
    %c0_10 = arith.constant 0 : index
    %12 = vector.load %arg5[%c0_9, %c0_10] : memref<1x384xf32, #tpu.memory_space<vmem>>, vector<1x384xf32>
    %13 = vector.broadcast %12 : vector<1x384xf32> to vector<2x384xf32>
    %14 = arith.addf %11, %13 : vector<2x384xf32>
    %cst_11 = arith.constant 0.000000e+00 : f32
    %15 = vector.broadcast %cst_11 : f32 to vector<2x384xf32>
    %16 = arith.maximumf %14, %15 : vector<2x384xf32>
    %c0_12 = arith.constant 0 : index
    %c0_13 = arith.constant 0 : index
    %17 = vector.load %arg6[%c0_12, %c0_13] : memref<1x384xf32, #tpu.memory_space<vmem>>, vector<1x384xf32>
    %18 = vector.broadcast %17 : vector<1x384xf32> to vector<2x384xf32>
    %19 = arith.mulf %16, %18 : vector<2x384xf32>
    %cst_14 = arith.constant dense<0.000000e+00> : vector<2xf32>
    %20 = vector.multi_reduction <add>, %19, %cst_14 [1] : vector<2x384xf32> to vector<2xf32>
    %21 = vector.shape_cast %20 : vector<2xf32> to vector<2x1xf32>
    %c0_15 = arith.constant 0 : index
    %c0_16 = arith.constant 0 : index
    %22 = vector.load %arg7[%c0_15, %c0_16] : memref<1x1xf32, #tpu.memory_space<vmem>>, vector<1x1xf32>
    %23 = vector.broadcast %22 : vector<1x1xf32> to vector<2x1xf32>
    %24 = arith.addf %21, %23 : vector<2x1xf32>
    %cst_17 = arith.constant 0.000000e+00 : f32
    %25 = vector.broadcast %cst_17 : f32 to vector<2x1xf32>
    %26 = arith.maximumf %24, %25 : vector<2x1xf32>
    %c0_18 = arith.constant 0 : index
    %c0_19 = arith.constant 0 : index
    %27 = vector.load %arg8[%c0_18, %c0_19] : memref<2x1xf32, #tpu.memory_space<vmem>>, vector<2x1xf32>
    tpu.vector_store %arg8[%c0_18, %c0_19], %26 {strides = array<i32>} : memref<2x1xf32, #tpu.memory_space<vmem>>, vector<2x1xf32>,
    return
  }
  func.func @transform_0(%arg0: i32) -> (i32, i32) {
    %c0_i32 = arith.constant 0 : i32
    %c0_i32_0 = arith.constant 0 : i32
    return %arg0, %c0_i32 : i32, i32
  }
  func.func @transform_1(%arg0: i32) -> (i32, i32) {
    %c0_i32 = arith.constant 0 : i32
    %c0_i32_0 = arith.constant 0 : i32
    %c0_i32_1 = arith.constant 0 : i32
    return %c0_i32, %c0_i32_0 : i32, i32
  }
  func.func @transform_2(%arg0: i32) -> (i32, i32) {
    %c0_i32 = arith.constant 0 : i32
    %c0_i32_0 = arith.constant 0 : i32
    %c0_i32_1 = arith.constant 0 : i32
    return %c0_i32, %c0_i32_0 : i32, i32
  }
  func.func @transform_3(%arg0: i32) -> (i32, i32) {
    %c0_i32 = arith.constant 0 : i32
    %c0_i32_0 = arith.constant 0 : i32
    %c0_i32_1 = arith.constant 0 : i32
    return %c0_i32, %c0_i32_0 : i32, i32
  }
  func.func @transform_4(%arg0: i32) -> (i32, i32) {
    %c0_i32 = arith.constant 0 : i32
    %c0_i32_0 = arith.constant 0 : i32
    %c0_i32_1 = arith.constant 0 : i32
    return %c0_i32, %c0_i32_0 : i32, i32
  }
  func.func @transform_5(%arg0: i32) -> (i32, i32) {
    %c0_i32 = arith.constant 0 : i32
    %c0_i32_0 = arith.constant 0 : i32
    %c0_i32_1 = arith.constant 0 : i32
    return %c0_i32, %c0_i32_0 : i32, i32
  }
  func.func @transform_6(%arg0: i32) -> (i32, i32) {
    %c0_i32 = arith.constant 0 : i32
    %c0_i32_0 = arith.constant 0 : i32
    %c0_i32_1 = arith.constant 0 : i32
    return %c0_i32, %c0_i32_0 : i32, i32
  }
  func.func @transform_7(%arg0: i32) -> (i32, i32) {
    %c0_i32 = arith.constant 0 : i32
    %c0_i32_0 = arith.constant 0 : i32
    return %arg0, %c0_i32 : i32, i32
  }
}

</mosaic_0001>

<bundles_post_ra>
// kernel: value_network_forward.1
= control target key start
LH: loop header
LB: loop body
LE: loop exit
PB: predicated region body
PF: predicated region fallthrough
CT: control target
= control target key end

     0   :  { %s1960_s0 = inlined_call_operand.hbm [shape: f32[2,8], index: 0, kind: input, shape index: {}]   ;;  %s1961_s1 = inlined_call_operand.hbm [shape: bf16[8,640], index: 1, kind: input, shape index: {}]   ;;  %s1962_s2 = inlined_call_operand.vmem [shape: f32[1,640], index: 2, kind: input, shape index: {}]   ;;  %s1963_s3 = inlined_call_operand.hbm [shape: bf16[640,384], index: 3, kind: input, shape index: {}]   ;;  %s1964_s4 = inlined_call_operand.vmem [shape: f32[1,384], index: 4, kind: input, shape index: {}]   ;;  %s1965_s5 = inlined_call_operand.vmem [shape: f32[1,384], index: 5, kind: input, shape index: {}]   ;;  %s1966_s6 = inlined_call_operand.<no memory space> [shape: f32[1,1], index: 6, kind: input, shape index: {}]   ;;  %s1967_s7 = inlined_call_operand.vmem [shape: f32[2,1], index: 7, kind: output, shape index: {}]  }
   0x1   :  { %v12_v0 = vstv %s1966_s6 }
   0x2   :  { %13 = vst [vmem:[#allocation2] sm:$0x1] %v12_v0 }
   0x3   :  { %14 = vsyncpa [#allocation4], 0 }
   0x4   :  { %15 = vsyncpa [#allocation6], 0  ;;  %s1820_s26 = smov [#allocation5]   ;;  %s1821_s28 = smov [#allocation3]  }
   0x5   :  { %s32_s27 = sshll.u32 %s1820_s26, 4  ;;  %s22_s29 = sshll.u32 %s1821_s28, 4  ;;  %s33_s27 = int_to_ptr.vmem [resolvable:$true] %s32_s27  ;;  %s23_s29 = int_to_ptr.vmem [resolvable:$true] %s22_s29 }
   0x6   :  { %s1764_s30 = scalar_lea.vmem %s33_s27, 320  ;;  %p1769_p1 = scmp.lt.s32.totalorder %s33_s27, %s33_s27 }
   0x7   :  { %p1765_p0 = scmp.ne.s32.totalorder %s33_s27, %s1764_s30  ;;  %p1770_p2 = scmp.lt.s32.totalorder %s1764_s30, %s1764_s30 }
   0x9   :  { %p1771_p3 = por %p1770_p2, %p1769_p1 }
   0xb   :  { %p1772_p4 = pnand %p1771_p3, %p1765_p0 }
   0xd   :  { %1775 = shalt.err (!%p1772_p4)
}
   0xe   :  { %35 = dma.hbm_to_vmem [thread:$0]  %s1961_s1, 320, %s33_s27, [#allocation6]  }
   0xf   :  { %s1784_s6 = scalar_lea.vmem %s23_s29, 32  ;;  %p1789_p6 = scmp.lt.s32.totalorder %s23_s29, %s23_s29 }
  0x10   :  { %p1785_p5 = scmp.ne.s32.totalorder %s23_s29, %s1784_s6  ;;  %p1790_p7 = scmp.lt.s32.totalorder %s1784_s6, %s1784_s6 }
  0x12   :  { %p1791_p8 = por %p1790_p7, %p1789_p6 }
  0x14   :  { %p1792_p9 = pnand %p1791_p8, %p1785_p5 }
  0x16   :  { %1795 = shalt.err (!%p1792_p9)
}
  0x17   :  { %25 = dma.hbm_to_vmem [thread:$0]  %s1960_s0, 32, %s23_s29, [#allocation4]  }
  0x18   :  { %s1822_s12 = smov [#allocation7]  }
  0x19   :  { %s43_s13 = sshll.u32 %s1822_s12, 4  ;;  %s44_s13 = int_to_ptr.vmem [resolvable:$true] %s43_s13 }
  0x1a   :  { %s1804_s14 = scalar_lea.vmem %s44_s13, 15360  ;;  %p1809_p11 = scmp.lt.s32.totalorder %s44_s13, %s44_s13 }
  0x1b   :  { %p1805_p10 = scmp.ne.s32.totalorder %s44_s13, %s1804_s14  ;;  %p1810_p12 = scmp.lt.s32.totalorder %s1804_s14, %s1804_s14 }
  0x1d   :  { %p1811_p13 = por %p1810_p12, %p1809_p11 }
  0x1f   :  { %p1812_p0 = pnand %p1811_p13, %p1805_p10 }
  0x21   :  { %1815 = shalt.err (!%p1812_p0)
}
  0x22   :  { %s1823_s1 = smov 192   ;;  %s1824_s15 = smov 12  }
  0x23   :  { %49 = dma.hbm_to_vmem [thread:$0]  %s1963_s3, 15360, %s44_s13, [#allocation6], %s1823_s1, %s1823_s1, %s1824_s15  }
  0x24   :  { %1816 = dma.done.wait [#allocation4], 32  }
  0x25   :  { %1817 = vsyncadd [#allocation4], 4294967264 }
  0x26   :  { %1818 = dma.done.wait [#allocation6], 15680  }
  0x27   :  { %1819 = vsyncadd [#allocation6], 4294951616  ;;  %v1825_v1 = vmov 0   ;;  %v68_v2 = vld [vmem:[#allocation5] sm:$0xff]  ;;  %vm115_vm0 = vcmask 1043456   ;;  %v69_v3 = vld [vmem:[#allocation5 + $0x8] sm:$0xff] }
  0x28   :  { %163 = vmatprep.mubr.bf16.mxu0 %v1825_v1  ;;  %204 = vmatprep.mubr.bf16.mxu1 %v1825_v1  ;;  %v66_v4 = vld [vmem:[#allocation3] sm:$0x3]  ;;  %v1372_v5 = vcombine.high %v68_v2, %v68_v2  ;;  %v1374_v6 = vcombine.high %v69_v3, %v69_v3  ;;  %v1371_v7 = vcombine.low %v68_v2, %v68_v2  ;;  %v1595_v9 = vld [vmem:[#allocation5 + $0x10] ss:$0 sps:$4 sm:$0xff]   ;;  %v1598_v10 = vld [vmem:[#allocation7 + $0xac] ss:$12 sps:$4 sm:$0xff]  }
  0x29   :  { %v1373_v8 = vcombine.low %v69_v3, %v69_v3  ;;  %v67_v13 = vpack.c.bf16 %v66_v4, %v66_v4  ;;  %vm111_vm1 = vcmask 64512   ;;  %v1826_v14 = vmov 0.0   ;;  %v1596_v16 = vld [vmem:[#allocation7 + $0xa8] ss:$12 sps:$4 sm:$0xff]   ;;  %v1601_v17 = vld [vmem:[#allocation7 + $0x22c] ss:$12 sps:$4 sm:$0xff]  }
  0x2a   :  { %1376 = vmatprep.subr.msk.bf16.mxu0 %vm115_vm0, %v1372_v5  ;;  %1378 = vmatprep.subr.msk.bf16.mxu1 %vm115_vm0, %v1374_v6  ;;  %v117_v11 = vsel %vm115_vm0, %v1371_v7, 0  ;;  %v129_v15 = vsel %vm115_vm0, %v1595_v9, 0  ;;  %v1604_v18 = vld [vmem:[#allocation7 + $0x94] ss:$12 sps:$4 sm:$0xff]   ;;  %vm1827_vm2 = vmmov 0   ;;  %vm1346_vm3 = vcmask 1041408  }
  0x2b   :  { %v123_v12 = vsel %vm115_vm0, %v1373_v8, 0  ;;  %146 = vmatpush1.bf16.msra.mxu0 %v117_v11  ;;  %v1602_v19 = vld [vmem:[#allocation7 + $0x90] ss:$12 sps:$4 sm:$0xff]   ;;  %v1599_v21 = vld [vmem:[#allocation7 + $0x228] ss:$12 sps:$4 sm:$0xff]   ;;  %vm1363_vm4 = vcmask 1024  }
  0x2c   :  { %187 = vmatpush1.bf16.msra.mxu1 %v123_v12  ;;  %1557 = vmatprep.subr.bf16.mxu0 %v1826_v14  ;;  %v1610_v20 = vld [vmem:[#allocation7 + $0x7c] ss:$12 sps:$4 sm:$0xff]   ;;  %v1607_v22 = vld [vmem:[#allocation7 + $0x214] ss:$12 sps:$4 sm:$0xff]   ;;  %v1608_v23 = vld [vmem:[#allocation7 + $0x78] ss:$12 sps:$4 sm:$0xff]  }
  0x2d   :  { %1080 = vmatprep.subr.bf16.mxu1 %v1598_v10  ;;  %v1616_v24 = vld [vmem:[#allocation7 + $0x64] ss:$12 sps:$4 sm:$0xff]   ;;  %v1613_v26 = vld [vmem:[#allocation7 + $0x1fc] ss:$12 sps:$4 sm:$0xff]   ;;  %v1614_v27 = vld [vmem:[#allocation7 + $0x60] ss:$12 sps:$4 sm:$0xff]  }
  0x2e   :  { %1377 = vmatmul.mubr.msk.bf16.vlgmr.msra.gmra.mxu0 %vm111_vm1, %v67_v13  ;;  %v1605_v25 = vld [vmem:[#allocation7 + $0x210] ss:$12 sps:$4 sm:$0xff]   ;;  %v1622_v28 = vld [vmem:[#allocation7 + $0x4c] ss:$12 sps:$4 sm:$0xff]   ;;  %v1620_v31 = vld [vmem:[#allocation7 + $0x48] ss:$12 sps:$4 sm:$0xff]  }
  0x2f   :  { %1379 = vmatmul.mubr.msk.bf16.vlgmr.msra.gmra.mxu1 %vm111_vm1, %v67_v13  ;;  %1558 = vmatpush3.bf16.msra.mxu0 %v129_v15  ;;  %v1611_v29 = vld [vmem:[#allocation7 + $0x1f8] ss:$12 sps:$4 sm:$0xff]   ;;  %v1628_v32 = vld [vmem:[#allocation7 + $0x34] ss:$12 sps:$4 sm:$0xff]   ;;  %v1626_v35 = vld [vmem:[#allocation7 + $0x30] ss:$12 sps:$4 sm:$0xff]  }
  0x30   :  { %1559 = vmatprep.mubr.msk.bf16.mxu0 %vm1827_vm2, %v1826_v14  ;;  %1121 = vmatprep.subr.bf16.mxu0 %v1601_v17  ;;  %v1619_v30 = vld [vmem:[#allocation7 + $0x1e4] ss:$12 sps:$4 sm:$0xff]   ;;  %v1617_v33 = vld [vmem:[#allocation7 + $0x1e0] ss:$12 sps:$4 sm:$0xff]   ;;  %v1634_v36 = vld [vmem:[#allocation7 + $0x1c] ss:$12 sps:$4 sm:$0xff]  }
  0x31   :  { %1081 = vmatpush1.bf16.msra.mxu1 %v1596_v16  ;;  %v1625_v34 = vld [vmem:[#allocation7 + $0x1cc] ss:$12 sps:$4 sm:$0xff]   ;;  %v1623_v37 = vld [vmem:[#allocation7 + $0x1c8] ss:$12 sps:$4 sm:$0xff]   ;;  %v1640_v40 = vld [vmem:[#allocation7 + $0x4] ss:$12 sps:$4 sm:$0xff]  }
  0x32   :  { %1082 = vmatprep.subr.bf16.mxu1 %v1604_v18  ;;  %v1631_v38 = vld [vmem:[#allocation7 + $0x1b4] ss:$12 sps:$4 sm:$0xff]   ;;  %v1632_v39 = vld [vmem:[#allocation7 + $0x18] ss:$12 sps:$4 sm:$0xff]   ;;  %v1629_v41 = vld [vmem:[#allocation7 + $0x1b0] ss:$12 sps:$4 sm:$0xff]  }
  0x33   :  { %v1637_v42 = vld [vmem:[#allocation7 + $0x19c] ss:$12 sps:$4 sm:$0xff]   ;;  %v1638_v43 = vld [vmem:[#allocation7] ss:$12 sps:$4 sm:$0xff]   ;;  %v1635_v45 = vld [vmem:[#allocation7 + $0x198] ss:$12 sps:$4 sm:$0xff]  }
  0x34   :  { %v1646_v44 = vld [vmem:[#allocation7 + $0x16c] ss:$12 sps:$4 sm:$0xff]   ;;  %v1643_v46 = vld [vmem:[#allocation7 + $0x184] ss:$12 sps:$4 sm:$0xff]   ;;  %v1644_v47 = vld [vmem:[#allocation7 + $0x168] ss:$12 sps:$4 sm:$0xff]  }
  0x35   :  { %1083 = vmatpush1.bf16.msra.mxu1 %v1602_v19  ;;  %v1641_v48 = vld [vmem:[#allocation7 + $0x180] ss:$12 sps:$4 sm:$0xff]   ;;  %v1650_v51 = vld [vmem:[#allocation7 + $0x150] ss:$12 sps:$4 sm:$0xff]   ;;  %v1647_v53 = vld [vmem:[#allocation7 + $0x2e8] ss:$12 sps:$4 sm:$0xff]   ;;  %v73_v19 = vlaneseq }
  0x36   :  { %1084 = vmatprep.subr.bf16.mxu1 %v1610_v20  ;;  %1560 = vmatmul.mubr.msk.bf16.vlgmr.msra.gmra.mxu0 %vm111_vm1, %v67_v13  ;;  %v1652_v49 = vld [vmem:[#allocation7 + $0x154] ss:$12 sps:$4 sm:$0xff]   ;;  %v1649_v50 = vld [vmem:[#allocation7 + $0x2ec] ss:$12 sps:$4 sm:$0xff]   ;;  %v1658_v52 = vld [vmem:[#allocation7 + $0x13c] ss:$12 sps:$4 sm:$0xff]  }
  0x37   :  { %1122 = vmatpush1.bf16.msra.mxu0 %v1599_v21  ;;  %v1655_v54 = vld [vmem:[#allocation7 + $0x2d4] ss:$12 sps:$4 sm:$0xff]   ;;  %v1656_v55 = vld [vmem:[#allocation7 + $0x138] ss:$12 sps:$4 sm:$0xff]   ;;  %v1653_v57 = vld [vmem:[#allocation7 + $0x2d0] ss:$12 sps:$4 sm:$0xff]  }
  0x38   :  { %1123 = vmatprep.subr.bf16.mxu0 %v1607_v22  ;;  %v1664_v56 = vld [vmem:[#allocation7 + $0x124] ss:$12 sps:$4 sm:$0xff]   ;;  %v1661_v58 = vld [vmem:[#allocation7 + $0x2bc] ss:$12 sps:$4 sm:$0xff]   ;;  %v1662_v59 = vld [vmem:[#allocation7 + $0x120] ss:$12 sps:$4 sm:$0xff]  }
  0x39   :  { %1085 = vmatpush1.bf16.msra.mxu1 %v1608_v23  ;;  %v1670_v60 = vld [vmem:[#allocation7 + $0x10c] ss:$12 sps:$4 sm:$0xff]   ;;  %v1667_v62 = vld [vmem:[#allocation7 + $0x2a4] ss:$12 sps:$4 sm:$0xff]   ;;  %v1668_v63 = vld [vmem:[#allocation7 + $0x108] ss:$12 sps:$4 sm:$0xff]  }
  0x3a   :  { %1086 = vmatprep.subr.bf16.mxu1 %v1616_v24  ;;  %v1659_v61 = vld [vmem:[#allocation7 + $0x2b8] ss:$12 sps:$4 sm:$0xff]   ;;  %v1676_v0 = vld [vmem:[#allocation7 + $0xf4] ss:$12 sps:$4 sm:$0xff]   ;;  %v1674_v4 = vld [vmem:[#allocation7 + $0xf0] ss:$12 sps:$4 sm:$0xff]  }
  0x3b   :  { %1124 = vmatpush1.bf16.msra.mxu0 %v1605_v25  ;;  %v1665_v2 = vld [vmem:[#allocation7 + $0x2a0] ss:$12 sps:$4 sm:$0xff]   ;;  %v1671_v5 = vld [vmem:[#allocation7 + $0x288] ss:$12 sps:$4 sm:$0xff]   ;;  %v1677_v7 = vld [vmem:[#allocation7 + $0x270] ss:$12 sps:$4 sm:$0xff]  }
  0x3c   :  { %1125 = vmatprep.subr.bf16.mxu0 %v1613_v26  ;;  %v1673_v3 = vld [vmem:[#allocation7 + $0x28c] ss:$12 sps:$4 sm:$0xff]   ;;  %v1679_v6 = vld [vmem:[#allocation7 + $0x274] ss:$12 sps:$4 sm:$0xff]   ;;  %v1682_v8 = vld [vmem:[#allocation7 + $0xdc] ss:$12 sps:$4 sm:$0xff]  }
  0x3d   :  { %1087 = vmatpush1.bf16.msra.mxu1 %v1614_v27  ;;  %v1685_v9 = vld [vmem:[#allocation7 + $0x25c] ss:$12 sps:$4 sm:$0xff]   ;;  %v1680_v10 = vld [vmem:[#allocation7 + $0xd8] ss:$12 sps:$4 sm:$0xff]   ;;  %v1686_v15 = vld [vmem:[#allocation7 + $0xc0] ss:$12 sps:$4 sm:$0xff]  }
  0x3e   :  { %1088 = vmatprep.subr.bf16.mxu1 %v1622_v28  ;;  %v1683_v11 = vld [vmem:[#allocation7 + $0x258] ss:$12 sps:$4 sm:$0xff]   ;;  %v1689_v16 = vld [vmem:[#allocation7 + $0x240] ss:$12 sps:$4 sm:$0xff]   ;;  %v1695_v18 = vld [vmem:[#allocation7 + $0x170] ss:$12 sps:$4 sm:$0xff]  }
  0x3f   :  { %1126 = vmatpush1.bf16.msra.mxu0 %v1611_v29  ;;  %v1688_v12 = vld [vmem:[#allocation7 + $0xc4] ss:$12 sps:$4 sm:$0xff]   ;;  %v1694_v17 = vld [vmem:[#allocation7 + $0x3ac] ss:$12 sps:$4 sm:$0xff]   ;;  %v1893_v20 = vshrl.u32 %v73_v19, 7 }
  0x40   :  { %1127 = vmatprep.subr.bf16.mxu0 %v1619_v30  ;;  %v1691_v13 = vld [vmem:[#allocation7 + $0x244] ss:$12 sps:$4 sm:$0xff]   ;;  %v1904_v23 = vld [vmem:[%s1962_s2] sm:$0x1f] }
  0x41   :  { %1089 = vmatpush1.bf16.msra.mxu1 %v1620_v31  ;;  %v1896_v21 = vsub.s32 0, %v1893_v20  ;;  %v1899_v22 = vsub.s32 2, %v1893_v20  ;;  %v1907_v24 = vsub.s32 1, %v1893_v20  ;;  %v87_v25 = vsub.s32 3, %v1893_v20  ;;  %v1726_v19 = vld [vmem:[#allocation7 + $0x20] ss:$12 sps:$4 sm:$0xff]  }
  0x42   :  { %1090 = vmatprep.subr.bf16.mxu1 %v1628_v32 }
  0x43   :  { %1128 = vmatpush1.bf16.msra.mxu0 %v1617_v33  ;;  %v76_v26 = vrot.slane %v1904_v23, %v1896_v21  ;;  %v84_v27 = vrot.slane %v1904_v23, %v1899_v22  ;;  %v80_v28 = vrot.slane %v1904_v23, %v1907_v24  ;;  %v88_v29 = vrot.slane %v1904_v23, %v87_v25  ;;  %v1730_v25 = vld [vmem:[#allocation7 + $0xc8] ss:$12 sps:$4 sm:$0xff]  }
  0x44   :  { %1129 = vmatprep.subr.bf16.mxu0 %v1625_v34 }
  0x45   :  { %1091 = vmatpush1.bf16.msra.mxu1 %v1626_v35 }
  0x46   :  { %1092 = vmatprep.subr.bf16.mxu1 %v1634_v36 }
  0x47   :  { %1130 = vmatpush1.bf16.msra.mxu0 %v1623_v37 }
  0x48   :  { %1131 = vmatprep.subr.bf16.mxu0 %v1631_v38 }
  0x49   :  { %1093 = vmatpush1.bf16.msra.mxu1 %v1632_v39 }
  0x4a   :  { %1094 = vmatprep.subr.bf16.mxu1 %v1640_v40 }
  0x4b   :  { %1132 = vmatpush1.bf16.msra.mxu0 %v1629_v41 }
  0x4c   :  { %1133 = vmatprep.subr.bf16.mxu0 %v1637_v42 }
  0x4d   :  { %1095 = vmatpush1.bf16.msra.mxu1 %v1638_v43 }
  0x4e   :  { %1096 = vmatprep.subr.bf16.mxu1 %v1646_v44 }
  0x4f   :  { %1134 = vmatpush1.bf16.msra.mxu0 %v1635_v45 }
  0x50   :  { %1135 = vmatprep.subr.bf16.mxu0 %v1643_v46 }
  0x51   :  { %1097 = vmatpush2.bf16.msra.mxu1 %v1644_v47 }
  0x52   :  { %1098 = vmatprep.subr.bf16.mxu1 %v1652_v49  ;;  %v1692_v49 = vld [vmem:[#allocation7 + $0x3a8] ss:$12 sps:$4 sm:$0xff]  }
  0x53   :  { %1136 = vmatpush1.bf16.msra.mxu0 %v1641_v48 }
  0x54   :  { %1137 = vmatprep.subr.bf16.mxu0 %v1649_v50  ;;  %v1696_v50 = vld [vmem:[#allocation7 + $0xb0] ss:$12 sps:$4 sm:$0xff]  }
  0x55   :  { %1099 = vmatpush2.bf16.msra.mxu1 %v1650_v51 }
  0x56   :  { %1100 = vmatprep.subr.bf16.mxu1 %v1658_v52  ;;  %v1699_v52 = vld [vmem:[#allocation7 + $0x394] ss:$12 sps:$4 sm:$0xff]  }
  0x57   :  { %1138 = vmatpush2.bf16.msra.mxu0 %v1647_v53 }
  0x58   :  { %1139 = vmatprep.subr.bf16.mxu0 %v1655_v54  ;;  %v1700_v54 = vld [vmem:[#allocation7 + $0x158] ss:$12 sps:$4 sm:$0xff]  }
  0x59   :  { %1101 = vmatpush2.bf16.msra.mxu1 %v1656_v55 }
  0x5a   :  { %1102 = vmatprep.subr.bf16.mxu1 %v1664_v56  ;;  %v1697_v56 = vld [vmem:[#allocation7 + $0x390] ss:$12 sps:$4 sm:$0xff]  }
  0x5b   :  { %1140 = vmatpush2.bf16.msra.mxu0 %v1653_v57  ;;  %v1701_v57 = vld [vmem:[#allocation7 + $0x98] ss:$12 sps:$4 sm:$0xff]  }
  0x5c   :  { %1141 = vmatprep.subr.bf16.mxu0 %v1661_v58  ;;  %v1704_v58 = vld [vmem:[#allocation7 + $0x37c] ss:$12 sps:$4 sm:$0xff]  }
  0x5d   :  { %1103 = vmatpush2.bf16.msra.mxu1 %v1662_v59  ;;  %v1705_v59 = vld [vmem:[#allocation7 + $0x140] ss:$12 sps:$4 sm:$0xff]  }
  0x5e   :  { %1104 = vmatprep.subr.bf16.mxu1 %v1670_v60 }
  0x5f   :  { %1142 = vmatpush2.bf16.msra.mxu0 %v1659_v61 }
  0x60   :  { %1143 = vmatprep.subr.bf16.mxu0 %v1667_v62  ;;  %v1702_v62 = vld [vmem:[#allocation7 + $0x378] ss:$12 sps:$4 sm:$0xff]  }
  0x61   :  { %1105 = vmatpush2.bf16.msra.mxu1 %v1668_v63  ;;  %v1706_v63 = vld [vmem:[#allocation7 + $0x80] ss:$12 sps:$4 sm:$0xff]  }
  0x62   :  { %1106 = vmatprep.subr.bf16.mxu1 %v1676_v0  ;;  %v1709_v0 = vld [vmem:[#allocation7 + $0x364] ss:$12 sps:$4 sm:$0xff]  }
  0x63   :  { %1144 = vmatpush2.bf16.msra.mxu0 %v1665_v2  ;;  %v1710_v2 = vld [vmem:[#allocation7 + $0x128] ss:$12 sps:$4 sm:$0xff]  }
  0x64   :  { %1145 = vmatprep.subr.bf16.mxu0 %v1673_v3  ;;  %v1707_v3 = vld [vmem:[#allocation7 + $0x360] ss:$12 sps:$4 sm:$0xff]  }
  0x65   :  { %1107 = vmatpush2.bf16.msra.mxu1 %v1674_v4  ;;  %v1711_v4 = vld [vmem:[#allocation7 + $0x68] ss:$12 sps:$4 sm:$0xff]  }
  0x66   :  { %1108 = vmatprep.subr.bf16.mxu1 %v1682_v8  ;;  %v1716_v8 = vld [vmem:[#allocation7 + $0x50] ss:$12 sps:$4 sm:$0xff]  }
  0x67   :  { %1146 = vmatpush2.bf16.msra.mxu0 %v1671_v5  ;;  %v1714_v5 = vld [vmem:[#allocation7 + $0x34c] ss:$12 sps:$4 sm:$0xff]  }
  0x68   :  { %1147 = vmatprep.subr.bf16.mxu0 %v1679_v6  ;;  %v1715_v6 = vld [vmem:[#allocation7 + $0x110] ss:$12 sps:$4 sm:$0xff]  }
  0x69   :  { %1109 = vmatpush2.bf16.msra.mxu1 %v1680_v10  ;;  %v1720_v10 = vld [vmem:[#allocation7 + $0xf8] ss:$12 sps:$4 sm:$0xff]  }
  0x6a   :  { %1110 = vmatprep.subr.bf16.mxu1 %v1688_v12  ;;  %v1717_v12 = vld [vmem:[#allocation7 + $0x330] ss:$12 sps:$4 sm:$0xff]  }
  0x6b   :  { %1148 = vmatpush2.bf16.msra.mxu0 %v1677_v7  ;;  %v91_v7 = vsub.s32 4, %v1893_v20  ;;  %v1729_v20 = vld [vmem:[#allocation7 + $0x304] ss:$12 sps:$4 sm:$0xff]  }
  0x6c   :  { %1149 = vmatprep.subr.bf16.mxu0 %v1685_v9  ;;  %v1719_v9 = vld [vmem:[#allocation7 + $0x334] ss:$12 sps:$4 sm:$0xff]  }
  0x6d   :  { %1111 = vmatpush2.bf16.msra.mxu1 %v1686_v15  ;;  %v1724_v15 = vld [vmem:[#allocation7 + $0x31c] ss:$12 sps:$4 sm:$0xff]  }
  0x6e   :  { %1162 = vmatprep.subr.bf16.mxu1 %v1694_v17 }
  0x6f   :  { %1150 = vmatpush2.bf16.msra.mxu0 %v1683_v11  ;;  %v92_v11 = vrot.slane %v1904_v23, %v91_v7  ;;  %v1727_v23 = vld [vmem:[#allocation7 + $0x300] ss:$12 sps:$4 sm:$0xff]  }
  0x70   :  { %1151 = vmatprep.subr.bf16.mxu0 %v1691_v13  ;;  %v1721_v13 = vld [vmem:[#allocation7 + $0x38] ss:$12 sps:$4 sm:$0xff]  }
  0x73   :  { %1152 = vmatpush2.bf16.msra.mxu0 %v1689_v16  ;;  %v1725_v16 = vld [vmem:[#allocation7 + $0xe0] ss:$12 sps:$4 sm:$0xff]  }
  0x74   :  { %1504 = vmatprep.subr.bf16.mxu0 %v1695_v18  ;;  %v1722_v18 = vld [vmem:[#allocation7 + $0x318] ss:$12 sps:$4 sm:$0xff]  }
  0xee   :  { %v165_v30 = vpop.f32.mrf.mxu0 }
  0xef   :  { %v206_v31 = vpop.f32.mrf.mxu1  ;;  %v166_v32 = vadd.f32 %v165_v30, %v76_v26  ;;  %v1733_v30 = vld [vmem:[#allocation7 + $0x230] ss:$12 sps:$4 sm:$0xff]  }
  0xf0   :  { %v207_v33 = vadd.f32 %v206_v31, %v84_v27  ;;  %v167_v34 = vpop.f32.mrf.mxu0  ;;  %v1731_v27 = vld [vmem:[#allocation7 + $0x8] ss:$12 sps:$4 sm:$0xff]   ;;  %v1734_v31 = vld [vmem:[#allocation7 + $0x3b0] ss:$12 sps:$4 sm:$0xff]  }
  0xf1   :  { %v208_v35 = vpop.f32.mrf.mxu1  ;;  %v168_v37 = vadd.f32 %v167_v34, %v80_v28  ;;  %v253_v39 = vmax.f32 %v166_v32, 0.0  ;;  %v1732_v28 = vld [vmem:[#allocation7 + $0x2f0] ss:$12 sps:$4 sm:$0xff]   ;;  %v1735_v32 = vld [vmem:[#allocation7 + $0x2d8] ss:$12 sps:$4 sm:$0xff]  }
  0xf2   :  { %v255_v36 = vmax.f32 %v207_v33, 0.0  ;;  %v209_v38 = vadd.f32 %v208_v35, %v88_v29  ;;  %v169_v40 = vpop.f32.mrf.mxu0  ;;  %v1736_v33 = vld [vmem:[#allocation7 + $0x218] ss:$12 sps:$4 sm:$0xff]   ;;  %v1738_v35 = vld [vmem:[#allocation7 + $0x2c0] ss:$12 sps:$4 sm:$0xff]  }
  0xf3   :  { %v210_v41 = vpop.f32.mrf.mxu1  ;;  %v254_v42 = vmax.f32 %v168_v37, 0.0  ;;  %v1921_v51 = vpack.c.bf16 %v253_v39, %v253_v39  ;;  %v1737_v34 = vld [vmem:[#allocation7 + $0x398] ss:$12 sps:$4 sm:$0xff]   ;;  %v1740_v37 = vld [vmem:[#allocation7 + $0x380] ss:$12 sps:$4 sm:$0xff]  }
  0xf4   :  { %v256_v43 = vmax.f32 %v209_v38, 0.0  ;;  %v1917_v44 = vpack.c.bf16 %v255_v36, %v255_v36  ;;  %v170_v45 = vpop.f32.mrf.mxu0  ;;  %v1739_v36 = vld [vmem:[#allocation7 + $0x200] ss:$12 sps:$4 sm:$0xff]   ;;  %v1741_v38 = vld [vmem:[#allocation7 + $0x2a8] ss:$12 sps:$4 sm:$0xff]  }
  0xf5   :  { %v211_v46 = vpop.f32.mrf.mxu1  ;;  %v259_v47 = vpack.c.bf16 %v254_v42, %v254_v42  ;;  %v1742_v39 = vld [vmem:[#allocation7 + $0x1e8] ss:$12 sps:$4 sm:$0xff]   ;;  %v1744_v41 = vld [vmem:[#allocation7 + $0x290] ss:$12 sps:$4 sm:$0xff]   ;;  %v1747_v45 = vld [vmem:[#allocation7 + $0x278] ss:$12 sps:$4 sm:$0xff]  }
  0xf6   :  { %v1919_v48 = vpack.c.bf16 %v256_v43, %v256_v43  ;;  %v247_v53 = vpop.f32.mrf.mxu0  ;;  %v1743_v40 = vld [vmem:[#allocation7 + $0x368] ss:$12 sps:$4 sm:$0xff]   ;;  %v1745_v42 = vld [vmem:[#allocation7 + $0x1d0] ss:$12 sps:$4 sm:$0xff]   ;;  %v1748_v46 = vld [vmem:[#allocation7 + $0x1b8] ss:$12 sps:$4 sm:$0xff]  }
  0xf7   :  { %1112 = vmatprep.mubr.bf16.mxu1 %v259_v47  ;;  %v248_v17 = vadd.f32 %v247_v53, %v92_v11  ;;  %v1746_v43 = vld [vmem:[#allocation7 + $0x350] ss:$12 sps:$4 sm:$0xff]   ;;  %v1755_v53 = vld [vmem:[#allocation7 + $0x308] ss:$12 sps:$4 sm:$0xff]  }
  0xf8   :  { %1153 = vmatprep.mubr.bf16.mxu0 %v1919_v48  ;;  %1113 = vmatmul.mubr.bf16.vlgmr.msra.gmra.mxu1 %v1921_v51  ;;  %v1561_v55 = vpop.f32.mrf.mxu0 }
  0xf9   :  { %1154 = vmatmul.mubr.bf16.vlgmr.msra.gmra.mxu0 %v1917_v44  ;;  %1163 = vmatpush1.bf16.msra.mxu1 %v1692_v49  ;;  %v257_v26 = vmax.f32 %v248_v17, 0.0  ;;  %v1751_v49 = vld [vmem:[#allocation7 + $0x1a0] ss:$12 sps:$4 sm:$0xff]  }
  0xfa   :  { %1505 = vmatpush3.bf16.msra.mxu0 %v1696_v50  ;;  %1235 = vmatprep.mubr.bf16.mxu0 %v259_v47  ;;  %v250_v60 = vpop.f32.mrf.mxu0  ;;  %v1749_v47 = vld [vmem:[#allocation7 + $0x338] ss:$12 sps:$4 sm:$0xff]   ;;  %v1752_v50 = vld [vmem:[#allocation7 + $0x320] ss:$12 sps:$4 sm:$0xff]  }
  0xfb   :  { %1164 = vmatprep.subr.bf16.mxu1 %v1699_v52  ;;  %1506 = vmatprep.subr.bf16.mxu0 %v1700_v54  ;;  %v262_v29 = vpack.c.bf16 %v257_v26, %v257_v26  ;;  %v1754_v52 = vld [vmem:[#allocation7 + $0x188] ss:$12 sps:$4 sm:$0xff]  }
  0xfc   :  { %1194 = vmatprep.mubr.bf16.mxu1 %v1825_v1  ;;  %v1562_v61 = vpop.f32.mrf.mxu0  ;;  %v1712_v1 = vld [vmem:[#allocation7 + $0x348] ss:$12 sps:$4 sm:$0xff]  }
  0xfd   :  { %1165 = vmatpush1.bf16.msra.mxu1 %v1697_v56  ;;  %v423_v54 = vld [vmem:[%s1964_s4] sm:$0x7] }
  0xfe   :  { %1507 = vmatpush3.bf16.msra.mxu0 %v1701_v57  ;;  %1166 = vmatprep.subr.bf16.mxu1 %v1704_v58  ;;  %v428_v55 = vrot.slane %v423_v54, %v1896_v21 }
  0xff   :  { %1508 = vmatprep.subr.bf16.mxu0 %v1705_v59 }
 0x101   :  { %1167 = vmatpush1.bf16.msra.mxu1 %v1702_v62 }
 0x102   :  { %1509 = vmatpush3.bf16.msra.mxu0 %v1706_v63  ;;  %1168 = vmatprep.subr.bf16.mxu1 %v1709_v0 }
 0x103   :  { %1510 = vmatprep.subr.bf16.mxu0 %v1710_v2  ;;  %v432_v2 = vrot.slane %v423_v54, %v1907_v24 }
 0x105   :  { %1169 = vmatpush1.bf16.msra.mxu1 %v1707_v3  ;;  %v1326_v3 = vld [vmem:[%s1965_s5] sm:$0x7] }
 0x106   :  { %1511 = vmatpush3.bf16.msra.mxu0 %v1711_v4  ;;  %1170 = vmatprep.subr.bf16.mxu1 %v1714_v5 }
 0x107   :  { %1512 = vmatprep.subr.bf16.mxu0 %v1715_v6 }
 0x109   :  { %1171 = vmatpush1.bf16.msra.mxu1 %v1712_v1  ;;  %v1331_v1 = vrot.slane %v1326_v3, %v1896_v21  ;;  %v436_v21 = vrot.slane %v423_v54, %v1899_v22 }
 0x10a   :  { %1513 = vmatpush3.bf16.msra.mxu0 %v1716_v8  ;;  %1172 = vmatprep.subr.bf16.mxu1 %v1719_v9 }
 0x10b   :  { %1514 = vmatprep.subr.bf16.mxu0 %v1720_v10 }
 0x10d   :  { %1173 = vmatpush1.bf16.msra.mxu1 %v1717_v12  ;;  %v1335_v12 = vrot.slane %v1326_v3, %v1907_v24 }
 0x10e   :  { %1515 = vmatpush3.bf16.msra.mxu0 %v1721_v13  ;;  %1174 = vmatprep.subr.bf16.mxu1 %v1724_v15 }
 0x10f   :  { %1516 = vmatprep.subr.bf16.mxu0 %v1725_v16 }
 0x111   :  { %1175 = vmatpush1.bf16.msra.mxu1 %v1722_v18 }
 0x112   :  { %1517 = vmatpush3.bf16.msra.mxu0 %v1726_v19  ;;  %1176 = vmatprep.subr.bf16.mxu1 %v1729_v20 }
 0x113   :  { %1518 = vmatprep.subr.bf16.mxu0 %v1730_v25 }
 0x115   :  { %1177 = vmatpush1.bf16.msra.mxu1 %v1727_v23 }
 0x116   :  { %1519 = vmatpush3.bf16.msra.mxu0 %v1731_v27  ;;  %1526 = vmatprep.subr.bf16.mxu1 %v1732_v28 }
 0x117   :  { %1563 = vmatprep.subr.bf16.mxu0 %v1826_v14 }
 0x118   :  { %1195 = vmatmul.mubr.bf16.vlgmr.msra.gmra.mxu1 %v262_v29 }
 0x119   :  { %1236 = vmatmul.mubr.bf16.vlgmr.msra.gmra.mxu0 %v1921_v51  ;;  %1527 = vmatpush3.bf16.msra.mxu1 %v1733_v30  ;;  %v1753_v51 = vld [vmem:[#allocation7 + $0x248] ss:$12 sps:$4 sm:$0xff]  }
 0x11a   :  { %1275 = vmatprep.mubr.bf16.mxu1 %v1919_v48  ;;  %1564 = vmatpush3.bf16.msra.mxu0 %v1734_v31  ;;  %v1750_v48 = vld [vmem:[#allocation7 + $0x260] ss:$12 sps:$4 sm:$0xff]  }
 0x11b   :  { %1528 = vmatprep.subr.bf16.mxu1 %v1735_v32  ;;  %1565 = vmatprep.subr.bf16.mxu0 %v1826_v14 }
 0x11c   :  { %1579 = vmatprep.mubr.msk.bf16.mxu0 %vm1827_vm2, %v1826_v14 }
 0x11d   :  { %1529 = vmatpush3.bf16.msra.mxu1 %v1736_v33 }
 0x11e   :  { %1566 = vmatpush3.bf16.msra.mxu0 %v1737_v34  ;;  %1530 = vmatprep.subr.bf16.mxu1 %v1738_v35 }
 0x11f   :  { %1567 = vmatprep.subr.bf16.mxu0 %v1826_v14 }
 0x121   :  { %1531 = vmatpush3.bf16.msra.mxu1 %v1739_v36 }
 0x122   :  { %1568 = vmatpush3.bf16.msra.mxu0 %v1740_v37  ;;  %1532 = vmatprep.subr.bf16.mxu1 %v1741_v38 }
 0x123   :  { %1569 = vmatprep.subr.bf16.mxu0 %v1826_v14 }
 0x125   :  { %1533 = vmatpush3.bf16.msra.mxu1 %v1742_v39  ;;  %v1339_v39 = vrot.slane %v1326_v3, %v1899_v22 }
 0x126   :  { %1570 = vmatpush3.bf16.msra.mxu0 %v1743_v40  ;;  %1534 = vmatprep.subr.bf16.mxu1 %v1744_v41 }
 0x127   :  { %1571 = vmatprep.subr.bf16.mxu0 %v1826_v14 }
 0x129   :  { %1535 = vmatpush3.bf16.msra.mxu1 %v1745_v42 }
 0x12a   :  { %1572 = vmatpush3.bf16.msra.mxu0 %v1746_v43  ;;  %1536 = vmatprep.subr.bf16.mxu1 %v1747_v45  ;;  %v1501_v45 = vld [vmem:[#allocation2] ss:$0 sm:$0xff] }
 0x12b   :  { %1573 = vmatprep.subr.bf16.mxu0 %v1826_v14 }
 0x12d   :  { %1537 = vmatpush3.bf16.msra.mxu1 %v1748_v46 }
 0x12e   :  { %1574 = vmatpush3.bf16.msra.mxu0 %v1749_v47  ;;  %1538 = vmatprep.subr.bf16.mxu1 %v1750_v48 }
 0x12f   :  { %1575 = vmatprep.subr.bf16.mxu0 %v1826_v14 }
 0x131   :  { %1539 = vmatpush3.bf16.msra.mxu1 %v1751_v49 }
 0x132   :  { %1576 = vmatpush3.bf16.msra.mxu0 %v1752_v50  ;;  %1540 = vmatprep.subr.bf16.mxu1 %v1753_v51 }
 0x133   :  { %1577 = vmatprep.subr.bf16.mxu0 %v1826_v14 }
 0x135   :  { %1541 = vmatpush3.bf16.msra.mxu1 %v1754_v52 }
 0x136   :  { %1578 = vmatpush3.bf16.msra.mxu0 %v1755_v53 }
 0x138   :  { %1276 = vmatmul.mubr.bf16.vlgmr.msra.gmra.mxu1 %v1917_v44 }
 0x139   :  { %1580 = vmatmul.mubr.bf16.vlgmr.msra.gmra.mxu0 %v262_v29 }
 0x1b8   :  { %v1114_v56 = vpop.f32.mrf.mxu1 }
 0x1b9   :  { %v1155_v57 = vpop.f32.mrf.mxu0  ;;  %v1115_v58 = vadd.f32 %v1114_v56, %v428_v55 }
 0x1ba   :  { %v1116_v59 = vpop.f32.mrf.mxu1 }
 0x1bb   :  { %v1157_v60 = vpop.f32.mrf.mxu0  ;;  %v1156_v61 = vadd.f32 %v1155_v57, %v1115_v58  ;;  %v1117_v44 = vadd.f32 %v1116_v59, %v432_v2 }
 0x1bc   :  { %v1118_v62 = vpop.f32.mrf.mxu1 }
 0x1bd   :  { %v1159_v63 = vpop.f32.mrf.mxu0  ;;  %v1158_v6 = vadd.f32 %v1157_v60, %v1117_v44 }
 0x1be   :  { %v1119_v14 = vpop.f32.mrf.mxu1 }
 0x1bf   :  { %v1160_v0 = vpop.f32.mrf.mxu0 }
 0x1d8   :  { %v1196_v4 = vpop.f32.mrf.mxu1 }
 0x1d9   :  { %v1520_v5 = vpop.f32.mrf.mxu0  ;;  %v1197_v7 = vadd.f32 %v1196_v4, %v1156_v61 }
 0x1da   :  { %v1198_v8 = vpop.f32.mrf.mxu1 }
 0x1db   :  { %v1521_v9 = vpop.f32.mrf.mxu0  ;;  %v1323_v10 = vmax.f32 %v1197_v7, 0.0  ;;  %v1199_v11 = vadd.f32 %v1198_v8, %v1158_v6 }
 0x1dc   :  { %v1200_v13 = vpop.f32.mrf.mxu1  ;;  %v1522_v27 = vadd.f32 %v1521_v9, %v1520_v5 }
 0x1dd   :  { %v1523_v15 = vpop.f32.mrf.mxu0  ;;  %v1343_v16 = vmul.f32 %v1331_v1, %v1323_v10  ;;  %v1324_v17 = vmax.f32 %v1199_v11, 0.0 }
 0x1de   :  { %v1201_v18 = vpop.f32.mrf.mxu1  ;;  %v1238_v24 = vadd.f32 %v1522_v27, %v436_v21 }
 0x1df   :  { %v1524_v19 = vpop.f32.mrf.mxu0  ;;  %v1344_v20 = vmul.f32 %v1335_v12, %v1324_v17  ;;  %v1347_v25 = vsel %vm1346_vm3, %v1343_v16, 0.0 }
 0x1e1   :  { %v1348_v26 = vsel %vm1346_vm3, %v1344_v20, 0.0 }
 0x1e2   :  { %v1349_v23 = vadd.f32 %v1348_v26, %v1347_v25 }
 0x1f8   :  { %v1542_v28 = vpop.f32.mrf.mxu1 }
 0x1f9   :  { %v1317_v29 = vpop.f32.mrf.mxu0 }
 0x1fa   :  { %v1543_v30 = vpop.f32.mrf.mxu1 }
 0x1fb   :  { %v1544_v31 = vadd.f32 %v1543_v30, %v1542_v28  ;;  %v1581_v32 = vpop.f32.mrf.mxu0 }
 0x1fc   :  { %v1545_v33 = vpop.f32.mrf.mxu1 }
 0x1fd   :  { %v1278_v34 = vadd.f32 %v1544_v31, %v1238_v24  ;;  %v1320_v35 = vpop.f32.mrf.mxu0 }
 0x1fe   :  { %v1546_v36 = vpop.f32.mrf.mxu1 }
 0x1ff   :  { %v1318_v37 = vadd.f32 %v1317_v29, %v1278_v34  ;;  %v1582_v38 = vpop.f32.mrf.mxu0 }
 0x201   :  { %v1325_v40 = vmax.f32 %v1318_v37, 0.0 }
 0x203   :  { %v1345_v41 = vmul.f32 %v1339_v39, %v1325_v40 }
 0x205   :  { %v1350_v42 = vsel %vm1346_vm3, %v1345_v41, 0.0 }
 0x206   :  { %v1351_v43 = vadd.f32 %v1350_v42, %v1349_v23 }
 0x208   :  { %1352 = vadd.xlane.f32.xlu0 %v1351_v43 }
 0x291   :  { %v1353_v46 = vpop.xlane.xlu0 %1352 }
 0x292   :  { %v1361_v47 = vadd.f32 %v1501_v45, %v1353_v46 }
 0x294   :  { %v1362_v48 = vmax.f32 %v1361_v47, 0.0 }
 0x296   :  { %1364 = vst.msk [vmem:[%s1967_s7] sm:$0x3] %vm1363_vm4, %v1362_v48 }
 0x297   :  { %1369 = vsyncpa [#allocation4], 1 }
 0x298   :  { %1370 = vsyncpa [#allocation6], 1 }

</bundles_post_ra>
